<compile_context>
chip_gen: v7x
topology: tpu7x:2x2x1
jax: 0.10.0
libtpu: 0.0.40
codegen_flags: <defaults>
</compile_context>

<pallas_src>
import jax
import jax.numpy as jnp
from jax.experimental import pallas as pl
from jax.experimental.pallas import tpu as pltpu


def _mlp_kernel(x_ref, w1_ref, b1_ref, w2_ref, b2_ref, o_ref):
    # Cast the f32 x tile to bf16 on the VPU (free in a mem-bound regime),
    # fc1 on the MXU with f32 accumulation.
    x = x_ref[...].astype(jnp.bfloat16)                                       # (TB, D) bf16
    h = jnp.dot(x, w1_ref[...], preferred_element_type=jnp.float32)           # (TB, H) f32
    h = jnp.maximum(h + b1_ref[...], 0.0)                                     # bias + ReLU (VPU, f32)
    # fc2 has a 1-wide output: VPU multiply + cross-lane (XLU) reduce instead
    # of an N=1 MXU matmul (which would use 1/128th of the MXU columns).
    z = jnp.sum(h * w2_ref[...], axis=-1)[None, :] + b2_ref[0, 0]             # (1, TB) f32
    # Exact sigmoid: exp on the EUP, exact division.  exp(-z) -> inf for very
    # negative z gives 1/(1+inf) = 0 exactly (no approx-reciprocal NaN risk).
    o_ref[...] = 1.0 / (1.0 + jnp.exp(-z))


def _round_up(n, m):
    return (n + m - 1) // m * m


def _choose_batch_tile(B, D, H, *, target_x_block_bytes=2 << 20,
                       h_block_cap_bytes=4 << 20, min_grid_steps=4):
    """Lane-dense batch tile sized by bytes, capped for VMEM and v7x 2-TC use."""
    tb_from_x = target_x_block_bytes // (4 * D)      # ~2 MiB of f32 x per block
    tb_from_h = h_block_cap_bytes // (4 * H)         # keep f32 h tile <= ~4 MiB
    tb = max(128, _round_up(min(tb_from_x, tb_from_h), 128))
    # Never larger than the lane-rounded batch.
    tb = min(tb, _round_up(B, 128))
    # v7x has 2 TensorCores: keep >=2 (ideally min_grid_steps) parallel grid
    # steps when the batch allows it.  Neutral on v5e/v6e (1 TC).
    max_steps = _round_up(B, 128) // 128
    want_steps = min(min_grid_steps, max_steps)
    if want_steps > 1:
        tb = min(tb, max(128, _round_up(pl.cdiv(B, want_steps), 128)))
    return tb


def _vmem_budget_bytes(tb, D, H):
    return (2 * tb * D * 4          # double-buffered f32 x tiles
            + tb * D * 2            # in-kernel bf16 cast of the x tile
            + 3 * tb * H * 4        # h / h*w2 / ReLU f32 intermediates
            + 2 * tb * 4            # double-buffered (1, tb) f32 output
            + 2 * (D * H * 2 + 2 * H * 4)   # resident w1 / b1 / w2
            + (2 << 20))            # compiler scratch slack


def binary_classification_forward(x, w1, b1, w2, b2):
    """Forward pass of BinaryClassificationModel.

    x : [B, D] float32 (read directly in f32; bf16 cast happens in-kernel)
    w1: [D, H]  (fc1.weight transposed), b1: [1, H]
    w2: [H, 1]  (fc2.weight transposed), b2: [1, 1]
    returns sigmoid(relu(x @ w1 + b1) @ w2 + b2) as [B, 1] float32.
    """
    B, D = x.shape
    H = w1.shape[1]

    tb = _choose_batch_tile(B, D, H)
    pb = _round_up(B, tb)              # padded (lane-dense) output width
    grid = pb // tb                    # last x block may extend past B: Pallas
                                       # masks the DMA; garbage rows only feed
                                       # trimmed output lanes (rows are independent).

    # Tiny one-off casts / reshapes of the (VMEM-resident) weights only.
    w1_b = w1.astype(jnp.bfloat16)                    # (D, H) bf16 for the MXU
    w2_row = w2.reshape(1, H).astype(jnp.float32)     # (1, H)
    b1_row = b1.reshape(1, H).astype(jnp.float32)     # (1, H)
    b2_s = b2.reshape(1, 1).astype(jnp.float32)       # scalar -> SMEM

    vmem_limit = int(min(max(_vmem_budget_bytes(tb, D, H), 32 << 20), 48 << 20))

    out = pl.pallas_call(
        _mlp_kernel,
        out_shape=jax.ShapeDtypeStruct((1, pb), jnp.float32),
        grid=(grid,),
        in_specs=[
            pl.BlockSpec((tb, D), lambda i: (i, 0)),                # x batch tile (f32)
            pl.BlockSpec((D, H), lambda i: (0, 0)),                 # w1: VMEM-resident
            pl.BlockSpec((1, H), lambda i: (0, 0)),                 # b1: VMEM-resident
            pl.BlockSpec((1, H), lambda i: (0, 0)),                 # w2 row: VMEM-resident
            pl.BlockSpec(memory_space=pltpu.MemorySpace.SMEM),      # b2 scalar in SMEM
        ],
        out_specs=pl.BlockSpec((1, tb), lambda i: (0, i)),          # lane-dense output blocks
        compiler_params=pltpu.CompilerParams(
            dimension_semantics=("parallel",),
            vmem_limit_bytes=vmem_limit,
        ),
    )(x, w1_b, b1_row, w2_row, b2_s)

    # (1, pb) -> (pb, 1) is the same element order (pure layout plumbing); trim padding.
    return out.reshape(pb, 1)[:B]


def init_params(key, input_dim, hidden=64):
    # Deterministic synthetic init matching nn.Linear shapes:
    #   fc1.weight: [64, input_dim], fc1.bias: [64]; fc2.weight: [1, 64], fc2.bias: [1]
    # Weights are stored transposed ([in, out]) for the kernel.
    k1, k2, k3, k4 = jax.random.split(key, 4)
    bound1 = 1.0 / jnp.sqrt(float(input_dim))
    bound2 = 1.0 / jnp.sqrt(float(hidden))
    w1 = jax.random.uniform(k1, (input_dim, hidden), jnp.float32, -bound1, bound1)
    b1 = jax.random.uniform(k2, (1, hidden), jnp.float32, -bound1, bound1)
    w2 = jax.random.uniform(k3, (hidden, 1), jnp.float32, -bound2, bound2)
    b2 = jax.random.uniform(k4, (1, 1), jnp.float32, -bound2, bound2)
    return w1, b1, w2, b2


if __name__ == "__main__":
    key = jax.random.PRNGKey(0)
    k_x, k_p, k_x2 = jax.random.split(key, 3)

    D, H = 32, 64
    w1, b1, w2, b2 = init_params(k_p, D, H)

    def reference(x):
        # Same bf16 rounding of the fc1 operands as the kernel (MXU-native),
        # f32 accumulation and f32 elementwise tail, exact sigmoid.
        h = jnp.dot(x.astype(jnp.bfloat16), w1.astype(jnp.bfloat16),
                    preferred_element_type=jnp.float32)
        h = jnp.maximum(h + b1, 0.0)
        return jax.nn.sigmoid(h @ w2 + b2)

    # Small batch: single 128-wide lane-dense block.
    x_small = jax.random.normal(k_x, (8, D), dtype=jnp.float32)
    out_small = jax.block_until_ready(
        binary_classification_forward(x_small, w1, b1, w2, b2))
    assert out_small.shape == (8, 1)
    assert jnp.allclose(out_small, reference(x_small), atol=2e-3, rtol=2e-3)

    # Ragged batch exercising the tiled grid (2 steps, last x block partially OOB).
    x_big = jax.random.normal(k_x2, (200, D), dtype=jnp.float32)
    out_big = jax.block_until_ready(
        binary_classification_forward(x_big, w1, b1, w2, b2))
    assert out_big.shape == (200, 1)
    assert jnp.allclose(out_big, reference(x_big), atol=2e-3, rtol=2e-3)

    print("KERNEL_OK")
</pallas_src>

<mosaic_0001>
module attributes {stable_mosaic.version = 11 : i64} {
  func.func @_mlp_kernel(%arg0: i32, %arg1: memref<128x32xf32, #tpu.memory_space<vmem>>, %arg2: memref<32x64xbf16, #tpu.memory_space<vmem>>, %arg3: memref<1x64xf32, #tpu.memory_space<vmem>>, %arg4: memref<1x64xf32, #tpu.memory_space<vmem>>, %arg5: memref<1x1xf32, #tpu.memory_space<smem>>, %arg6: memref<1x128xf32, #tpu.memory_space<vmem>>) attributes {dimension_semantics = [#tpu.dimension_semantics<parallel>], iteration_bounds = array<i64: 1>, scalar_prefetch = 0 : i64, scratch_operands = 0 : i64, tpu.core_type = #tpu.core_type<tc>, window_params = [{transform_indices = @transform_0, window_bounds = array<i64: 128, 32>}, {pipeline_mode = #tpu.pipeline_mode<synchronous>, transform_indices = @transform_1, window_bounds = array<i64: 32, 64>}, {pipeline_mode = #tpu.pipeline_mode<synchronous>, transform_indices = @transform_2, window_bounds = array<i64: 1, 64>}, {pipeline_mode = #tpu.pipeline_mode<synchronous>, transform_indices = @transform_3, window_bounds = array<i64: 1, 64>}, {transform_indices = @transform_4, window_bounds = array<i64: 1, 1>}, {transform_indices = @transform_5, window_bounds = array<i64: 1, 128>}]} {
    %c0 = arith.constant 0 : index
    %c0_0 = arith.constant 0 : index
    %0 = vector.load %arg1[%c0, %c0_0] : memref<128x32xf32, #tpu.memory_space<vmem>>, vector<128x32xf32>
    %1 = arith.truncf %0 : vector<128x32xf32> to vector<128x32xbf16>
    %c0_1 = arith.constant 0 : index
    %c0_2 = arith.constant 0 : index
    %2 = vector.load %arg2[%c0_1, %c0_2] : memref<32x64xbf16, #tpu.memory_space<vmem>>, vector<32x64xbf16>
    %cst = arith.constant dense<0.000000e+00> : vector<128x64xf32>
    %3 = tpu.matmul %1, %2, %cst {dimension_numbers = #tpu.dot_dimension_numbers<[1], [0], [0], [1], [0, 0, 1, 1], [], []>} : vector<128x32xbf16>, vector<32x64xbf16>, vector<128x64xf32> -> vector<128x64xf32>
    %c0_3 = arith.constant 0 : index
    %c0_4 = arith.constant 0 : index
    %4 = vector.load %arg3[%c0_3, %c0_4] : memref<1x64xf32, #tpu.memory_space<vmem>>, vector<1x64xf32>
    %5 = vector.broadcast %4 : vector<1x64xf32> to vector<128x64xf32>
    %6 = arith.addf %3, %5 : vector<128x64xf32>
    %cst_5 = arith.constant 0.000000e+00 : f32
    %7 = vector.broadcast %cst_5 : f32 to vector<128x64xf32>
    %8 = arith.maximumf %6, %7 : vector<128x64xf32>
    %c0_6 = arith.constant 0 : index
    %c0_7 = arith.constant 0 : index
    %9 = vector.load %arg4[%c0_6, %c0_7] : memref<1x64xf32, #tpu.memory_space<vmem>>, vector<1x64xf32>
    %10 = vector.broadcast %9 : vector<1x64xf32> to vector<128x64xf32>
    %11 = arith.mulf %8, %10 : vector<128x64xf32>
    %cst_8 = arith.constant dense<0.000000e+00> : vector<128xf32>
    %12 = vector.multi_reduction <add>, %11, %cst_8 [1] : vector<128x64xf32> to vector<128xf32>
    %13 = vector.shape_cast %12 : vector<128xf32> to vector<1x128xf32>
    %c0_9 = arith.constant 0 : index
    %c0_10 = arith.constant 0 : index
    %14 = memref.load %arg5[%c0_9, %c0_10] : memref<1x1xf32, #tpu.memory_space<smem>>
    %15 = vector.broadcast %14 : f32 to vector<1x128xf32>
    %16 = arith.addf %13, %15 : vector<1x128xf32>
    %cst_11 = arith.constant 0.000000e+00 : f32
    %17 = vector.broadcast %cst_11 : f32 to vector<1x128xf32>
    %18 = arith.subf %17, %16 : vector<1x128xf32>
    %19 = math.exp %18 : vector<1x128xf32>
    %cst_12 = arith.constant 1.000000e+00 : f32
    %20 = vector.broadcast %cst_12 : f32 to vector<1x128xf32>
    %21 = arith.addf %20, %19 : vector<1x128xf32>
    %cst_13 = arith.constant 1.000000e+00 : f32
    %22 = vector.broadcast %cst_13 : f32 to vector<1x128xf32>
    %23 = arith.divf %22, %21 : vector<1x128xf32>
    %c0_14 = arith.constant 0 : index
    %c0_15 = arith.constant 0 : index
    %24 = vector.load %arg6[%c0_14, %c0_15] : memref<1x128xf32, #tpu.memory_space<vmem>>, vector<1x128xf32>
    tpu.vector_store %arg6[%c0_14, %c0_15], %23 {strides = array<i32>} : memref<1x128xf32, #tpu.memory_space<vmem>>, vector<1x128xf32>,
    return
  }
  func.func @transform_0(%arg0: i32) -> (i32, i32) {
    %c0_i32 = arith.constant 0 : i32
    %c0_i32_0 = arith.constant 0 : i32
    return %arg0, %c0_i32 : i32, i32
  }
  func.func @transform_1(%arg0: i32) -> (i32, i32) {
    %c0_i32 = arith.constant 0 : i32
    %c0_i32_0 = arith.constant 0 : i32
    %c0_i32_1 = arith.constant 0 : i32
    return %c0_i32, %c0_i32_0 : i32, i32
  }
  func.func @transform_2(%arg0: i32) -> (i32, i32) {
    %c0_i32 = arith.constant 0 : i32
    %c0_i32_0 = arith.constant 0 : i32
    %c0_i32_1 = arith.constant 0 : i32
    return %c0_i32, %c0_i32_0 : i32, i32
  }
  func.func @transform_3(%arg0: i32) -> (i32, i32) {
    %c0_i32 = arith.constant 0 : i32
    %c0_i32_0 = arith.constant 0 : i32
    %c0_i32_1 = arith.constant 0 : i32
    return %c0_i32, %c0_i32_0 : i32, i32
  }
  func.func @transform_4(%arg0: i32) -> (i32, i32) {
    %c0_i32 = arith.constant 0 : i32
    %c0_i32_0 = arith.constant 0 : i32
    %c0_i32_1 = arith.constant 0 : i32
    return %c0_i32, %c0_i32_0 : i32, i32
  }
  func.func @transform_5(%arg0: i32) -> (i32, i32) {
    %c0_i32 = arith.constant 0 : i32
    %c0_i32_0 = arith.constant 0 : i32
    return %c0_i32, %arg0 : i32, i32
  }
}

</mosaic_0001>

<bundles_post_ra>
// kernel: tpu_custom_call.1
= control target key start
LH: loop header
LB: loop body
LE: loop exit
PB: predicated region body
PF: predicated region fallthrough
CT: control target
= control target key end

     0   :  { %11 = vsyncpa [#allocation4], 0  ;;  %s963_s0 = inlined_call_operand.hbm [shape: f32[8,32], index: 0, kind: input, shape index: {}]   ;;  %s964_s1 = inlined_call_operand.hbm [shape: bf16[32,64], index: 1, kind: input, shape index: {}]   ;;  %s965_s2 = inlined_call_operand.vmem [shape: f32[1,64], index: 2, kind: input, shape index: {}]   ;;  %s966_s3 = inlined_call_operand.vmem [shape: f32[1,64], index: 3, kind: input, shape index: {}]   ;;  %s967_s4 = inlined_call_operand.<no memory space> [shape: f32[1,1], index: 4, kind: input, shape index: {}]   ;;  %s968_s5 = inlined_call_operand.hbm [shape: f32[1,128], index: 5, kind: output, shape index: {}]  }
   0x1   :  { %12 = vsyncpa [#allocation7], 0 }
   0x2   :  { %13 = vsyncpa [#allocation5], 0 }
   0x3   :  { %18 = vsyncadd [#allocation4], 1920  ;;  %s758_s18 = smov [#allocation3]   ;;  %s686_s22 = scalar_lea.hbm %s963_s0, 128 }
   0x4   :  { %s19_s19 = sshll.u32 %s758_s18, 4  ;;  %p687_p0 = scmp.ne.s32.totalorder %s963_s0, %s686_s22  ;;  %s20_s19 = int_to_ptr.vmem [resolvable:$true] %s19_s19 }
   0x5   :  { %p690_p1 = scmp.lt.u32.totalorder %s686_s22, %s963_s0 }
   0x7   :  { %p692_p2 = pnand %p690_p1, %p687_p0 }
   0x9   :  { %695 = shalt.err (!%p692_p2)
}
   0xa   :  { %s696_s27 = scalar_lea.vmem %s20_s19, 128  ;;  %s700_s28 = scalar_lea.vmem %s20_s19, 2048 }
   0xb   :  { %p697_p3 = scmp.ne.s32.totalorder %s20_s19, %s696_s27  ;;  %p701_p4 = scmp.lt.s32.totalorder %s20_s19, %s20_s19 }
   0xc   :  { %p702_p5 = scmp.lt.s32.totalorder %s700_s28, %s696_s27 }
   0xe   :  { %p703_p6 = por %p702_p5, %p701_p4 }
  0x10   :  { %p704_p7 = pnand %p703_p6, %p697_p3 }
  0x12   :  { %707 = shalt.err (!%p704_p7)
}
  0x13   :  { %s759_s29 = smov 128   ;;  %s760_s30 = smov 8  }
  0x14   :  { %25 = dma.hbm_to_vmem [thread:$0]  %s963_s0, 128, %s20_s19, [#allocation4], %s759_s29, %s759_s29, %s760_s30  }
  0x15   :  { %s761_s8 = smov [#allocation6]   ;;  %s708_s12 = scalar_lea.hbm %s964_s1, 256 }
  0x16   :  { %s31_s9 = sshll.u32 %s761_s8, 4  ;;  %p709_p8 = scmp.ne.s32.totalorder %s964_s1, %s708_s12  ;;  %s32_s9 = int_to_ptr.vmem [resolvable:$true] %s31_s9 }
  0x17   :  { %p712_p9 = scmp.lt.u32.totalorder %s708_s12, %s964_s1 }
  0x19   :  { %p714_p10 = pnand %p712_p9, %p709_p8 }
  0x1b   :  { %717 = shalt.err (!%p714_p10)
}
  0x1c   :  { %s718_s17 = scalar_lea.vmem %s32_s9, 256  ;;  %p723_p12 = scmp.lt.s32.totalorder %s32_s9, %s32_s9 }
  0x1d   :  { %p719_p11 = scmp.ne.s32.totalorder %s32_s9, %s718_s17  ;;  %p724_p13 = scmp.lt.s32.totalorder %s718_s17, %s718_s17 }
  0x1f   :  { %p725_p0 = por %p724_p13, %p723_p12 }
  0x21   :  { %p726_p1 = pnand %p725_p0, %p719_p11 }
  0x23   :  { %729 = shalt.err (!%p726_p1)
}
  0x24   :  { %s762_s0 = smov 64   ;;  %s763_s18 = smov 4  }
  0x25   :  { %37 = dma.hbm_to_vmem [thread:$0]  %s964_s1, 256, %s32_s9, [#allocation7], %s762_s0, %s762_s0, %s763_s18  }
  0x26   :  { %752 = dma.done.wait [#allocation4], 2048  }
  0x27   :  { %753 = vsyncadd [#allocation4], 4294965248 }
  0x28   :  { %754 = dma.done.wait [#allocation7], 256  }
  0x29   :  { %755 = vsyncadd [#allocation7], 4294967040  ;;  %v620_v0 = vld [vmem:[#allocation6] sm:$0xff]   ;;  %v621_v1 = vld [vmem:[#allocation6 + $0x8] sm:$0xff]   ;;  %vm98_vm0 = vcmask 261120   ;;  %vm259_vm1 = vcmask 523264  }
  0x2a   :  { %589 = vmatprep.subr.bf16.mxu0 %v620_v0  ;;  %609 = vmatprep.subr.bf16.mxu1 %v620_v0  ;;  %v51_v2 = vld [vmem:[#allocation3] sm:$0xff]  ;;  %v52_v3 = vld [vmem:[#allocation3 + $0x8] sm:$0xff]  ;;  %v53_v4 = vld [vmem:[#allocation3 + $0x10] sm:$0xff]  ;;  %vm449_vm2 = vcmask 130112   ;;  %vm456_vm3 = vcmask 195712   ;;  %vm463_vm4 = vcmask 261312  }
  0x2b   :  { %590 = vmatpush3.bf16.msra.mxu0 %v620_v0  ;;  %611 = vmatpush3.bf16.msra.mxu1 %v620_v0  ;;  %v67_v5 = vpack.c.bf16 %v52_v3, %v51_v2  ;;  %v54_v6 = vld [vmem:[#allocation3 + $0x18] sm:$0xff]  ;;  %v59_v7 = vld [vmem:[#allocation3 + $0x40] sm:$0xff]  ;;  %v60_v8 = vld [vmem:[#allocation3 + $0x48] sm:$0xff]  ;;  %vm470_vm5 = vcmask 326912   ;;  %vm477_vm6 = vcmask 392512   ;;  %vm484_vm7 = vcmask 458112  }
  0x2c   :  { %591 = vmatprep.subr.bf16.mxu0 %v621_v1  ;;  %610 = vmatprep.subr.bf16.mxu1 %v621_v1  ;;  %v71_v9 = vpack.c.bf16 %v60_v8, %v59_v7  ;;  %v61_v10 = vld [vmem:[#allocation3 + $0x50] sm:$0xff]  ;;  %v62_v11 = vld [vmem:[#allocation3 + $0x58] sm:$0xff]  ;;  %v55_v12 = vld [vmem:[#allocation3 + $0x20] sm:$0xff]  ;;  %v68_v14 = vpack.c.bf16 %v54_v6, %v53_v4  ;;  %vm491_vm8 = vcmask 523712   ;;  %vm498_vm9 = vcmask 589312  }
  0x2d   :  { %593 = vmatprep.mubr.msk.bf16.mxu0 %vm98_vm0, %v67_v5  ;;  %v56_v13 = vld [vmem:[#allocation3 + $0x28] sm:$0xff]  ;;  %v72_v15 = vpack.c.bf16 %v62_v11, %v61_v10  ;;  %v63_v16 = vld [vmem:[#allocation3 + $0x60] sm:$0xff]  ;;  %v57_v20 = vld [vmem:[#allocation3 + $0x30] sm:$0xff]  ;;  %vm505_vm10 = vcmask 654912   ;;  %vm512_vm11 = vcmask 720512   ;;  %vm519_vm12 = vcmask 786112  }
  0x2e   :  { %601 = vmatprep.mubr.msk.bf16.mxu1 %vm98_vm0, %v71_v9  ;;  %v64_v17 = vld [vmem:[#allocation3 + $0x68] sm:$0xff]  ;;  %v69_v18 = vpack.c.bf16 %v56_v13, %v55_v12  ;;  %v58_v21 = vld [vmem:[#allocation3 + $0x38] sm:$0xff]  ;;  %v65_v22 = vld [vmem:[#allocation3 + $0x70] sm:$0xff]  ;;  %vm526_vm13 = vcmask 851712   ;;  %vm533_vm14 = vcmask 917312   ;;  %vm540_vm15 = vcmask 982912  }
  0x2f   :  { %592 = vmatpush3.bf16.msra.mxu0 %v621_v1  ;;  %612 = vmatpush3.bf16.msra.mxu1 %v621_v1  ;;  %v73_v19 = vpack.c.bf16 %v64_v17, %v63_v16  ;;  %v66_v23 = vld [vmem:[#allocation3 + $0x78] sm:$0xff]  ;;  %v70_v24 = vpack.c.bf16 %v58_v21, %v57_v20  ;;  %v830_v26 = vld [vmem:[%s965_s2] ss:$0 sm:$0xff] }
  0x30   :  { %v74_v25 = vpack.c.bf16 %v66_v23, %v65_v22  ;;  %v838_v36 = vld [vmem:[%s966_s3] ss:$0 sm:$0xff] }
  0x32   :  { %594 = vmatmul.mubr.msk.bf16.vlgmr.msra.gmra.mrb[0].mxu0 %vm98_vm0, %v68_v14  ;;  %602 = vmatmul.mubr.msk.bf16.vlgmr.msra.gmra.mrb[0].mxu1 %vm98_vm0, %v72_v15 }
  0x33   :  { %597 = vmatprep.mubr.msk.bf16.mxu0 %vm98_vm0, %v69_v18  ;;  %605 = vmatprep.mubr.msk.bf16.mxu1 %vm98_vm0, %v73_v19 }
  0x3a   :  { %598 = vmatmul.mubr.msk.bf16.gmra.mrb[4].mxu0 %vm98_vm0, %v70_v24  ;;  %606 = vmatmul.mubr.msk.bf16.gmra.mrb[4].mxu1 %vm98_vm0, %v74_v25  ;;  %vm547_vm0 = vcmask 1048512  }
 0x105   :  { %v595_v27 = vpop.f32.mrb[0].mxu0  ;;  %v603_v28 = vpop.f32.mrb[0].mxu1 }
 0x106   :  { %v166_v29 = vadd.f32 %v595_v27, %v830_v26  ;;  %v157_v30 = vpop.f32.mrb[1].mxu0  ;;  %v189_v31 = vpop.f32.mrb[1].mxu1  ;;  %v198_v13 = vadd.f32 %v603_v28, %v830_v26 }
 0x107   :  { %v158_v32 = vadd.f32 %v830_v26, %v157_v30  ;;  %v596_v33 = vpop.f32.mrb[2].mxu0  ;;  %v190_v34 = vadd.f32 %v830_v26, %v189_v31  ;;  %v604_v35 = vpop.f32.mrb[2].mxu1 }
 0x108   :  { %v222_v37 = vmax.f32 %v166_v29, 0.0  ;;  %v169_v38 = vadd.f32 %v596_v33, %v830_v26  ;;  %v160_v39 = vpop.f32.mrb[3].mxu0  ;;  %v192_v40 = vpop.f32.mrb[3].mxu1  ;;  %v201_v9 = vadd.f32 %v604_v35, %v830_v26  ;;  %v230_v21 = vmax.f32 %v198_v13, 0.0 }
 0x109   :  { %v220_v41 = vmax.f32 %v158_v32, 0.0  ;;  %v228_v42 = vmax.f32 %v190_v34, 0.0  ;;  %v161_v43 = vadd.f32 %v830_v26, %v160_v39  ;;  %v193_v44 = vadd.f32 %v830_v26, %v192_v40 }
 0x10a   :  { %v223_v45 = vmax.f32 %v169_v38, 0.0  ;;  %v245_v46 = vmul.f32 %v838_v36, %v222_v37  ;;  %v231_v19 = vmax.f32 %v201_v9, 0.0  ;;  %v253_v32 = vmul.f32 %v838_v36, %v230_v21 }
 0x10b   :  { %v243_v47 = vmul.f32 %v838_v36, %v220_v41  ;;  %v251_v48 = vmul.f32 %v838_v36, %v228_v42  ;;  %v229_v49 = vmax.f32 %v193_v44, 0.0  ;;  %v221_v52 = vmax.f32 %v161_v43, 0.0 }
 0x10c   :  { %v266_v50 = vsel %vm259_vm1, %v245_v46, 0.0  ;;  %v246_v51 = vmul.f32 %v838_v36, %v223_v45  ;;  %v254_v28 = vmul.f32 %v838_v36, %v231_v19  ;;  %v290_v38 = vsel %vm259_vm1, %v253_v32, 0.0 }
 0x10d   :  { %267 = vadd.xlane.f32.xlu1 %v266_v50  ;;  %v599_v53 = vpop.f32.mrb[4].mxu0  ;;  %v260_v54 = vsel %vm259_vm1, %v243_v47, 0.0  ;;  %v607_v55 = vpop.f32.mrb[4].mxu1  ;;  %v284_v60 = vsel %vm259_vm1, %v251_v48, 0.0  ;;  %v252_v2 = vmul.f32 %v838_v36, %v229_v49  ;;  %v244_v6 = vmul.f32 %v838_v36, %v221_v52 }
 0x10e   :  { %v182_v56 = vadd.f32 %v599_v53, %v830_v26  ;;  %261 = vadd.xlane.f32.xlu0 %v260_v54  ;;  %v173_v57 = vpop.f32.mrb[5].mxu0  ;;  %v205_v58 = vpop.f32.mrb[5].mxu1  ;;  %v269_v0 = vsel %vm259_vm1, %v246_v51, 0.0  ;;  %v214_v29 = vadd.f32 %v607_v55, %v830_v26  ;;  %v293_v35 = vsel %vm259_vm1, %v254_v28, 0.0 }
 0x10f   :  { %v600_v59 = vpop.f32.mrb[6].mxu0  ;;  %v608_v61 = vpop.f32.mrb[6].mxu1  ;;  %v174_v4 = vadd.f32 %v830_v26, %v173_v57  ;;  %v287_v11 = vsel %vm259_vm1, %v252_v2, 0.0  ;;  %v263_v15 = vsel %vm259_vm1, %v244_v6, 0.0  ;;  %v206_v22 = vadd.f32 %v830_v26, %v205_v58 }
 0x110   :  { %v226_v62 = vmax.f32 %v182_v56, 0.0  ;;  %v185_v63 = vadd.f32 %v600_v59, %v830_v26  ;;  %v176_v1 = vpop.f32.mrb[7].mxu0  ;;  %v208_v3 = vpop.f32.mrb[7].mxu1  ;;  %v217_v25 = vadd.f32 %v608_v61, %v830_v26  ;;  %v234_v37 = vmax.f32 %v214_v29, 0.0 }
 0x111   :  { %270 = vadd.xlane.f32.xlu1 %v269_v0  ;;  %v177_v5 = vadd.f32 %v830_v26, %v176_v1  ;;  %v224_v14 = vmax.f32 %v174_v4, 0.0  ;;  %v209_v17 = vadd.f32 %v830_v26, %v208_v3  ;;  %v232_v30 = vmax.f32 %v206_v22, 0.0 }
 0x112   :  { %v227_v7 = vmax.f32 %v185_v63, 0.0  ;;  %285 = vadd.xlane.f32.xlu0 %v284_v60  ;;  %v249_v8 = vmul.f32 %v838_v36, %v226_v62  ;;  %v235_v34 = vmax.f32 %v217_v25, 0.0  ;;  %v257_v42 = vmul.f32 %v838_v36, %v234_v37 }
 0x113   :  { %v225_v10 = vmax.f32 %v177_v5, 0.0  ;;  %v247_v23 = vmul.f32 %v838_v36, %v224_v14  ;;  %v233_v24 = vmax.f32 %v209_v17, 0.0  ;;  %v255_v39 = vmul.f32 %v838_v36, %v232_v30 }
 0x114   :  { %v250_v12 = vmul.f32 %v838_v36, %v227_v7  ;;  %v278_v18 = vsel %vm259_vm1, %v249_v8, 0.0  ;;  %v258_v40 = vmul.f32 %v838_v36, %v235_v34  ;;  %v302_v44 = vsel %vm259_vm1, %v257_v42, 0.0 }
 0x115   :  { %288 = vadd.xlane.f32.xlu1 %v287_v11  ;;  %v248_v20 = vmul.f32 %v838_v36, %v225_v10  ;;  %v272_v31 = vsel %vm259_vm1, %v247_v23, 0.0  ;;  %v256_v33 = vmul.f32 %v838_v36, %v233_v24  ;;  %v296_v41 = vsel %vm259_vm1, %v255_v39, 0.0 }
 0x116   :  { %264 = vadd.xlane.f32.xlu0 %v263_v15  ;;  %v281_v16 = vsel %vm259_vm1, %v250_v12, 0.0  ;;  %v305_v43 = vsel %vm259_vm1, %v258_v40, 0.0  ;;  %v888_v45 = vstv %s967_s4  ;;  %s764_s4 = smov [#allocation8]  }
 0x117   :  { %v275_v27 = vsel %vm259_vm1, %v248_v20, 0.0  ;;  %v299_v26 = vsel %vm259_vm1, %v256_v33, 0.0  ;;  %s557_s24 = sshll.u32 %s764_s4, 4  ;;  %s558_s24 = int_to_ptr.vmem [resolvable:$true] %s557_s24 }
 0x118   :  { %s730_s25 = scalar_lea.vmem %s558_s24, 16  ;;  %s734_s26 = scalar_lea.vmem %s558_s24, 32 }
 0x119   :  { %282 = vadd.xlane.f32.xlu1 %v281_v16  ;;  %p731_p2 = scmp.ne.s32.totalorder %s558_s24, %s730_s25  ;;  %p735_p3 = scmp.lt.s32.totalorder %s558_s24, %s558_s24 }
 0x11a   :  { %279 = vadd.xlane.f32.xlu0 %v278_v18  ;;  %p736_p4 = scmp.lt.s32.totalorder %s734_s26, %s730_s25 }
 0x11c   :  { %p737_p5 = por %p736_p4, %p735_p3 }
 0x11d   :  { %276 = vadd.xlane.f32.xlu1 %v275_v27 }
 0x11e   :  { %273 = vadd.xlane.f32.xlu0 %v272_v31  ;;  %p738_p6 = pnand %p737_p5, %p731_p2 }
 0x121   :  { %294 = vadd.xlane.f32.xlu1 %v293_v35 }
 0x122   :  { %291 = vadd.xlane.f32.xlu0 %v290_v38 }
 0x125   :  { %300 = vadd.xlane.f32.xlu1 %v299_v26  ;;  %v438_v26 = vlaneseq }
 0x126   :  { %297 = vadd.xlane.f32.xlu0 %v296_v41 }
 0x129   :  { %306 = vadd.xlane.f32.xlu1 %v305_v43 }
 0x12a   :  { %303 = vadd.xlane.f32.xlu0 %v302_v44 }
 0x19a   :  { %v268_v46 = vpop.xlane.xlu1 %267 }
 0x19b   :  { %v262_v47 = vpop.xlane.xlu0 %261  ;;  %v312_v49 = vadd.f32 %v888_v45, %v268_v46 }
 0x19c   :  { %v310_v48 = vadd.f32 %v888_v45, %v262_v47 }
 0x19d   :  { %v328_v53 = vsub.f32 0.0, %v312_v49 }
 0x19e   :  { %v326_v50 = vsub.f32 0.0, %v310_v48  ;;  %v271_v36 = vpop.xlane.xlu1 %270 }
 0x19f   :  { %v313_v51 = vadd.f32 %v888_v45, %v271_v36  ;;  %v286_v52 = vpop.xlane.xlu0 %285  ;;  %v346_v59 = vmul.f32 1.442695, %v328_v53 }
 0x1a0   :  { %v342_v54 = vmul.f32 1.442695, %v326_v50  ;;  %v318_v60 = vadd.f32 %v888_v45, %v286_v52  ;;  %v906_v52 = vand.u32 127, %v438_v26 }
 0x1a1   :  { %v329_v56 = vsub.f32 0.0, %v313_v51 }
 0x1a2   :  { %v289_v55 = vpop.xlane.xlu1 %288  ;;  %622 = vpow2.f32 %v342_v54  ;;  %v334_v6 = vsub.f32 0.0, %v318_v60 }
 0x1a3   :  { %v265_v57 = vpop.xlane.xlu0 %264  ;;  %v348_v63 = vmul.f32 1.442695, %v329_v56  ;;  %v319_v0 = vadd.f32 %v888_v45, %v289_v55  ;;  %624 = vpow2.f32 %v346_v59 }
 0x1a4   :  { %v311_v58 = vadd.f32 %v888_v45, %v265_v57  ;;  %v358_v16 = vmul.f32 1.442695, %v334_v6  ;;  %v444_v57 = vadd.s32 4294967288, %v906_v52 }
 0x1a5   :  { %v335_v9 = vsub.f32 0.0, %v319_v0  ;;  %v451_v0 = vadd.s32 4294967280, %v906_v52 }
 0x1a6   :  { %v327_v61 = vsub.f32 0.0, %v311_v58  ;;  %v283_v62 = vpop.xlane.xlu1 %282 }
 0x1a7   :  { %v317_v1 = vadd.f32 %v888_v45, %v283_v62  ;;  %v280_v2 = vpop.xlane.xlu0 %279  ;;  %v360_v20 = vmul.f32 1.442695, %v335_v9 }
 0x1a8   :  { %v344_v3 = vmul.f32 1.442695, %v327_v61  ;;  %v316_v4 = vadd.f32 %v888_v45, %v280_v2 }
 0x1a9   :  { %v333_v5 = vsub.f32 0.0, %v317_v1 }
 0x1aa   :  { %626 = vpow2.f32 %v344_v3  ;;  %v332_v7 = vsub.f32 0.0, %v316_v4  ;;  %v277_v8 = vpop.xlane.xlu1 %276 }
 0x1ab   :  { %628 = vpow2.f32 %v348_v63  ;;  %v356_v10 = vmul.f32 1.442695, %v333_v5  ;;  %v315_v11 = vadd.f32 %v888_v45, %v277_v8  ;;  %v274_v12 = vpop.xlane.xlu0 %273  ;;  %v458_v8 = vadd.s32 4294967272, %v906_v52 }
 0x1ac   :  { %v354_v13 = vmul.f32 1.442695, %v332_v7  ;;  %v314_v14 = vadd.f32 %v888_v45, %v274_v12  ;;  %v623_v19 = vpop.eup %622 }
 0x1ad   :  { %v331_v15 = vsub.f32 0.0, %v315_v11  ;;  %630 = vpow2.f32 %v356_v10  ;;  %v374_v28 = vadd.f32 1.0, %v623_v19  ;;  %v625_v31 = vpop.eup %624  ;;  %v465_v19 = vadd.s32 4294967264, %v906_v52 }
 0x1ae   :  { %v330_v17 = vsub.f32 0.0, %v314_v14  ;;  %v295_v18 = vpop.xlane.xlu1 %294  ;;  %632 = vpow2.f32 %v354_v13  ;;  %v376_v42 = vadd.f32 1.0, %v625_v31  ;;  %v918_v14 = vadd.s32 4294967232, %v906_v52 }
 0x1af   :  { %v352_v21 = vmul.f32 1.442695, %v331_v15  ;;  %v321_v22 = vadd.f32 %v888_v45, %v295_v18  ;;  %v292_v23 = vpop.xlane.xlu0 %291  ;;  %v921_v15 = vadd.s32 4294967224, %v906_v52 }
 0x1b0   :  { %v350_v24 = vmul.f32 1.442695, %v330_v17  ;;  %v320_v25 = vadd.f32 %v888_v45, %v292_v23  ;;  %v486_v23 = vadd.s32 4294967240, %v906_v52 }
 0x1b1   :  { %634 = vpow2.f32 %v352_v21  ;;  %v337_v27 = vsub.f32 0.0, %v321_v22 }
 0x1b2   :  { %636 = vpow2.f32 %v358_v16  ;;  %v336_v29 = vsub.f32 0.0, %v320_v25  ;;  %v301_v30 = vpop.xlane.xlu1 %300 }
 0x1b3   :  { %638 = vpow2.f32 %v360_v20  ;;  %v364_v32 = vmul.f32 1.442695, %v337_v27  ;;  %v323_v33 = vadd.f32 %v888_v45, %v301_v30  ;;  %v298_v34 = vpop.xlane.xlu0 %297  ;;  %v479_v27 = vadd.s32 4294967248, %v906_v52 }
 0x1b4   :  { %v627_v35 = vpop.eup %626  ;;  %640 = vpow2.f32 %v350_v24  ;;  %v362_v37 = vmul.f32 1.442695, %v336_v29  ;;  %v322_v38 = vadd.f32 %v888_v45, %v298_v34 }
 0x1b5   :  { %v629_v39 = vpop.eup %628  ;;  %v375_v40 = vadd.f32 1.0, %v627_v35  ;;  %642 = vpow2.f32 %v364_v32  ;;  %v339_v41 = vsub.f32 0.0, %v323_v33 }
 0x1b6   :  { %644 = vrcp.f32 %v374_v28  ;;  %v338_v43 = vsub.f32 0.0, %v322_v38  ;;  %v307_v44 = vpop.xlane.xlu1 %306  ;;  %v377_v49 = vadd.f32 1.0, %v629_v39  ;;  %v472_v28 = vadd.s32 4294967256, %v906_v52 }
 0x1b7   :  { %646 = vrcp.f32 %v375_v40  ;;  %v368_v46 = vmul.f32 1.442695, %v339_v41  ;;  %v325_v47 = vadd.f32 %v888_v45, %v307_v44  ;;  %v304_v48 = vpop.xlane.xlu0 %303  ;;  %v631_v51 = vpop.eup %630  ;;  %v514_v40 = vadd.s32 4294967208, %v906_v52 }
 0x1b8   :  { %648 = vpow2.f32 %v362_v37  ;;  %v366_v50 = vmul.f32 1.442695, %v338_v43  ;;  %v324_v36 = vadd.f32 %v888_v45, %v304_v48  ;;  %v633_v54 = vpop.eup %632  ;;  %v909_v45 = vshrl.u32 %v438_v26, 7 }
 0x1b9   :  { %650 = vpow2.f32 %v368_v46  ;;  %v341_v53 = vsub.f32 0.0, %v325_v47  ;;  %v380_v58 = vadd.f32 1.0, %v633_v54  ;;  %v381_v2 = vadd.f32 1.0, %v631_v51 }
 0x1ba   :  { %652 = vrcp.f32 %v376_v42  ;;  %v340_v55 = vsub.f32 0.0, %v324_v36  ;;  %v447_v5 = vsub.s32 %v444_v57, %v909_v45  ;;  %v454_v11 = vsub.s32 %v451_v0, %v909_v45 }
 0x1bb   :  { %v635_v56 = vpop.eup %634  ;;  %654 = vpow2.f32 %v366_v50  ;;  %v372_v59 = vmul.f32 1.442695, %v341_v53  ;;  %v442_v12 = vsub.s32 %v906_v52, %v909_v45  ;;  %v461_v22 = vsub.s32 %v458_v8, %v909_v45 }
 0x1bc   :  { %v637_v60 = vpop.eup %636  ;;  %656 = vrcp.f32 %v377_v49  ;;  %v379_v61 = vadd.f32 1.0, %v635_v56  ;;  %v370_v62 = vmul.f32 1.442695, %v340_v55  ;;  %v496_v30 = vsub.s32 %v918_v14, %v909_v45 }
 0x1bd   :  { %v639_v63 = vpop.eup %638  ;;  %658 = vrcp.f32 %v380_v58  ;;  %v382_v4 = vadd.f32 1.0, %v637_v60  ;;  %v503_v34 = vsub.s32 %v921_v15, %v909_v45  ;;  %v468_v37 = vsub.s32 %v465_v19, %v909_v45 }
 0x1be   :  { %v641_v1 = vpop.eup %640  ;;  %660 = vrcp.f32 %v379_v61  ;;  %v383_v9 = vadd.f32 1.0, %v639_v63  ;;  %v507_v26 = vadd.s32 4294967216, %v906_v52  ;;  %v489_v42 = vsub.s32 %v486_v23, %v909_v45 }
 0x1bf   :  { %v643_v3 = vpop.eup %642  ;;  %v378_v6 = vadd.f32 1.0, %v641_v1  ;;  %662 = vpow2.f32 %v372_v59  ;;  %v482_v43 = vsub.s32 %v479_v27, %v909_v45  ;;  %v475_v44 = vsub.s32 %v472_v28, %v909_v45 }
 0x1c0   :  { %v645_v7 = vpop.eup %644  ;;  %664 = vpow2.f32 %v370_v62  ;;  %v385_v16 = vadd.f32 1.0, %v643_v3  ;;  %v521_v51 = vadd.s32 4294967200, %v906_v52  ;;  %v510_v55 = vsub.s32 %v507_v26, %v909_v45 }
 0x1c1   :  { %v647_v10 = vpop.eup %646  ;;  %666 = vrcp.f32 %v378_v6  ;;  %v443_v25 = vrot.slane %v645_v7, %v442_v12  ;;  %v517_v56 = vsub.s32 %v514_v40, %v909_v45  ;;  %v528_v63 = vadd.s32 4294967192, %v906_v52 }
 0x1c2   :  { %v649_v13 = vpop.eup %648  ;;  %668 = vrcp.f32 %v381_v2  ;;  %v448_v18 = vrot.slane %v647_v10, %v447_v5  ;;  %v524_v3 = vsub.s32 %v521_v51, %v909_v45  ;;  %v535_v7 = vadd.s32 4294967184, %v906_v52 }
 0x1c3   :  { %v651_v17 = vpop.eup %650  ;;  %670 = vrcp.f32 %v382_v4  ;;  %v384_v20 = vadd.f32 1.0, %v649_v13  ;;  %v542_v10 = vadd.s32 4294967176, %v906_v52  ;;  %v531_v14 = vsub.s32 %v528_v63, %v909_v45 }
 0x1c4   :  { %v653_v21 = vpop.eup %652  ;;  %672 = vrcp.f32 %v383_v9  ;;  %v387_v31 = vadd.f32 1.0, %v651_v17  ;;  %v450_v35 = vsel %vm449_vm2, %v448_v18, %v443_v25 }
 0x1c5   :  { %v655_v24 = vpop.eup %654  ;;  %674 = vrcp.f32 %v384_v20  ;;  %v455_v39 = vrot.slane %v653_v21, %v454_v11  ;;  %v538_v20 = vsub.s32 %v535_v7, %v909_v45 }
 0x1c6   :  { %v657_v29 = vpop.eup %656  ;;  %676 = vrcp.f32 %v385_v16  ;;  %v386_v32 = vadd.f32 1.0, %v655_v24 }
 0x1c7   :  { %v659_v33 = vpop.eup %658  ;;  %v457_v47 = vsel %vm456_vm3, %v455_v39, %v450_v35  ;;  %v462_v50 = vrot.slane %v657_v29, %v461_v22  ;;  %v545_v22 = vsub.s32 %v542_v10, %v909_v45 }
 0x1c8   :  { %v661_v38 = vpop.eup %660  ;;  %678 = vrcp.f32 %v386_v32  ;;  %v483_v61 = vrot.slane %v659_v33, %v482_v43 }
 0x1c9   :  { %v663_v41 = vpop.eup %662  ;;  %680 = vrcp.f32 %v387_v31  ;;  %v476_v58 = vrot.slane %v661_v38, %v475_v44  ;;  %v464_v59 = vsel %vm463_vm4, %v462_v50, %v457_v47 }
 0x1ca   :  { %v665_v46 = vpop.eup %664  ;;  %v389_v48 = vadd.f32 1.0, %v663_v41 }
 0x1cb   :  { %v667_v49 = vpop.eup %666  ;;  %v388_v36 = vadd.f32 1.0, %v665_v46 }
 0x1cc   :  { %v669_v53 = vpop.eup %668  ;;  %v469_v54 = vrot.slane %v667_v49, %v468_v37  ;;  %682 = vrcp.f32 %v389_v48 }
 0x1cd   :  { %v671_v57 = vpop.eup %670  ;;  %684 = vrcp.f32 %v388_v36  ;;  %v490_v1 = vrot.slane %v669_v53, %v489_v42 }
 0x1ce   :  { %v673_v60 = vpop.eup %672  ;;  %v471_v62 = vsel %vm470_vm5, %v469_v54, %v464_v59  ;;  %v497_v5 = vrot.slane %v671_v57, %v496_v30 }
 0x1cf   :  { %v675_v0 = vpop.eup %674  ;;  %v478_v2 = vsel %vm477_vm6, %v476_v58, %v471_v62  ;;  %v504_v8 = vrot.slane %v673_v60, %v503_v34 }
 0x1d0   :  { %v677_v4 = vpop.eup %676  ;;  %v485_v6 = vsel %vm484_vm7, %v483_v61, %v478_v2  ;;  %v511_v12 = vrot.slane %v675_v0, %v510_v55 }
 0x1d1   :  { %v492_v9 = vsel %vm491_vm8, %v490_v1, %v485_v6  ;;  %v518_v16 = vrot.slane %v677_v4, %v517_v56 }
 0x1d2   :  { %v679_v11 = vpop.eup %678  ;;  %v499_v13 = vsel %vm498_vm9, %v497_v5, %v492_v9 }
 0x1d3   :  { %v506_v15 = vsel %vm505_vm10, %v504_v8, %v499_v13  ;;  %v525_v17 = vrot.slane %v679_v11, %v524_v3  ;;  %v681_v18 = vpop.eup %680 }
 0x1d4   :  { %v513_v19 = vsel %vm512_vm11, %v511_v12, %v506_v15  ;;  %v532_v25 = vrot.slane %v681_v18, %v531_v14 }
 0x1d5   :  { %v520_v21 = vsel %vm519_vm12, %v518_v16, %v513_v19 }
 0x1d6   :  { %v683_v23 = vpop.eup %682  ;;  %v527_v24 = vsel %vm526_vm13, %v525_v17, %v520_v21 }
 0x1d7   :  { %v685_v52 = vpop.eup %684  ;;  %v534_v28 = vsel %vm533_vm14, %v532_v25, %v527_v24  ;;  %v546_v29 = vrot.slane %v683_v23, %v545_v22 }
 0x1d8   :  { %v539_v27 = vrot.slane %v685_v52, %v538_v20 }
 0x1da   :  { %v541_v30 = vsel %vm540_vm15, %v539_v27, %v534_v28 }
 0x1db   :  { %v548_v31 = vsel %vm547_vm0, %v546_v29, %v541_v30 }
 0x1dc   :  { %550 = vst [vmem:[#allocation8] sm:$0x1] %v548_v31 }
 0x1dd   :  { %741 = shalt.err (!%p738_p6)
}
 0x1de   :  { %s742_s29 = scalar_lea.hbm %s968_s5, 16 }
 0x1df   :  { %p743_p7 = scmp.ne.s32.totalorder %s968_s5, %s742_s29  ;;  %p746_p8 = scmp.lt.u32.totalorder %s742_s29, %s968_s5 }
 0x1e1   :  { %p748_p9 = pnand %p746_p8, %p743_p7 }
 0x1e3   :  { %751 = shalt.err (!%p748_p9)
}
 0x1e4   :  { %560 = dma.vmem_to_hbm [thread:$0]  %s558_s24, 16, %s968_s5, [#allocation5]  }
 0x1e5   :  { %756 = dma.done.wait [#allocation5], 16  }
 0x1e6   :  { %757 = vsyncadd [#allocation5], 4294967280 }
 0x1e7   :  { %564 = vsyncpa [#allocation4], 1 }
 0x1e8   :  { %565 = vsyncpa [#allocation7], 1 }
 0x1e9   :  { %566 = vsyncpa [#allocation5], 1 }

</bundles_post_ra>
